<compile_context>
chip_gen: v5e
topology: v5e:2x2
jax: 0.10.0
libtpu: 0.0.40
codegen_flags: <defaults>
</compile_context>

<pallas_src>
import jax
import jax.numpy as jnp
from jax.experimental import pallas as pl
from jax.experimental.pallas import tpu as pltpu

HIDDEN = 256


def _mlp_kernel(x_ref, w1_ref, b1_ref, w2_ref, b2_ref, out_ref):
    # x_ref  : (TB, D)        bfloat16
    # w1_ref : (D, HIDDEN)    bfloat16   (resident across grid steps)
    # b1_ref : (1, HIDDEN)    float32    (resident)
    # w2_ref : (1, HIDDEN)    float32    (resident; second layer as a row)
    # b2_ref : (1,)           float32    (SMEM scalar)
    # out_ref: (TB//128, 128) float32    (lane-dense output slab)

    # Layer 1: MXU matmul with f32 accumulation, then bias + ReLU on the VPU.
    h = jnp.dot(x_ref[...], w1_ref[...], preferred_element_type=jnp.float32)
    h = jnp.maximum(h + b1_ref[...], 0.0)          # (TB, HIDDEN) f32

    # Layer 2: (HIDDEN -> 1) as VPU multiply + lane reduction (no N=1 MXU op).
    prod = h * w2_ref[...]                         # (TB, HIDDEN) f32
    rows, lanes = out_ref.shape                    # TB // 128, 128
    hidden = prod.shape[-1]
    y = jnp.sum(prod.reshape(rows, lanes, hidden), axis=-1) + b2_ref[0]
    out_ref[...] = y.astype(out_ref.dtype)


def net_forward(x, w1, b1, w2, b2, *, block_rows=1024):
    """Forward pass of Net as a Pallas TPU kernel.

    x  : (B, D) float32
    w1 : (D, HIDDEN), b1 : (HIDDEN,)
    w2 : (HIDDEN, 1),  b2 : (1,)
    returns (B, 1) float32
    """
    B, D = x.shape
    assert w1.shape == (D, HIDDEN)

    # Row tile: multiple of 128, at most `block_rows`, at most padded-B.
    b_pad128 = pl.cdiv(B, 128) * 128
    tb = max(128, (min(block_rows, b_pad128) // 128) * 128)
    nb = pl.cdiv(B, tb)
    b_pad = nb * tb

    # Pad batch (padded rows are sliced away after the call).
    if b_pad != B:
        x = jnp.pad(x, ((0, b_pad - B), (0, 0)))

    # bf16 on the MXU input path, f32 everywhere else.
    x_bf = x.astype(jnp.bfloat16)
    w1_bf = w1.astype(jnp.bfloat16)
    b1_row = b1.reshape(1, HIDDEN).astype(jnp.float32)
    w2_row = w2.reshape(1, HIDDEN).astype(jnp.float32)   # (HIDDEN,1) -> row
    b2_s = b2.reshape(1).astype(jnp.float32)

    out_slab = pl.pallas_call(
        _mlp_kernel,
        out_shape=jax.ShapeDtypeStruct((b_pad // 128, 128), jnp.float32),
        grid=(nb,),
        in_specs=[
            pl.BlockSpec((tb, D), lambda i: (i, 0)),            # x: batch-tiled
            pl.BlockSpec((D, HIDDEN), lambda i: (0, 0)),        # w1: resident
            pl.BlockSpec((1, HIDDEN), lambda i: (0, 0)),        # b1: resident
            pl.BlockSpec((1, HIDDEN), lambda i: (0, 0)),        # w2 row: resident
            pl.BlockSpec(memory_space=pltpu.MemorySpace.SMEM),  # b2: SMEM scalar
        ],
        out_specs=pl.BlockSpec((tb // 128, 128), lambda i: (i, 0)),
        compiler_params=pltpu.CompilerParams(
            dimension_semantics=("parallel",),
        ),
    )(x_bf, w1_bf, b1_row, w2_row, b2_s)

    # Lane-dense slab -> (B, 1)
    return out_slab.reshape(b_pad)[:B].reshape(B, 1)


def net_reference_f32(x, w1, b1, w2, b2):
    h = jnp.maximum(x @ w1 + b1, 0.0)
    return h @ w2 + b2


def net_reference_bf16(x, w1, b1, w2, b2):
    # Same numerics path as the kernel: bf16 inputs to the first matmul,
    # f32 accumulation and f32 second stage.
    xb = x.astype(jnp.bfloat16)
    w1b = w1.astype(jnp.bfloat16)
    h = jnp.dot(xb, w1b, preferred_element_type=jnp.float32) + b1
    h = jnp.maximum(h, 0.0)
    return h @ w2 + b2


if __name__ == "__main__":
    key = jax.random.PRNGKey(0)
    B, D = 200, 33  # small batch / feature count (stand-in for train_features.shape[1])

    k_x, k_w1, k_b1, k_w2, k_b2 = jax.random.split(key, 5)

    x = jax.random.normal(k_x, (B, D), dtype=jnp.float32)

    # nn.Linear-style uniform(-1/sqrt(fan_in), 1/sqrt(fan_in)) init.
    bound1 = 1.0 / jnp.sqrt(jnp.float32(D))
    w1 = jax.random.uniform(k_w1, (D, HIDDEN), jnp.float32, -bound1, bound1)
    b1 = jax.random.uniform(k_b1, (HIDDEN,), jnp.float32, -bound1, bound1)

    bound2 = 1.0 / jnp.sqrt(jnp.float32(HIDDEN))
    w2 = jax.random.uniform(k_w2, (HIDDEN, 1), jnp.float32, -bound2, bound2)
    b2 = jax.random.uniform(k_b2, (1,), jnp.float32, -bound2, bound2)

    out = net_forward(x, w1, b1, w2, b2)
    out = jax.block_until_ready(out)

    ref_exact = net_reference_bf16(x, w1, b1, w2, b2)   # same bf16/f32 path
    ref_f32 = net_reference_f32(x, w1, b1, w2, b2)      # original f32 semantics

    assert out.shape == (B, 1)
    assert jnp.allclose(out, ref_exact, atol=1e-3, rtol=1e-3), "mismatch vs bf16-path reference"
    assert jnp.allclose(out, ref_f32, atol=5e-2, rtol=5e-2), "mismatch vs f32 reference"

    print("KERNEL_OK")
</pallas_src>

<mosaic_0001>
module attributes {stable_mosaic.version = 11 : i64} {
  func.func @_mlp_kernel(%arg0: i32, %arg1: memref<256x33xbf16, #tpu.memory_space<vmem>>, %arg2: memref<33x256xbf16, #tpu.memory_space<vmem>>, %arg3: memref<1x256xf32, #tpu.memory_space<vmem>>, %arg4: memref<1x256xf32, #tpu.memory_space<vmem>>, %arg5: memref<1xf32, #tpu.memory_space<smem>>, %arg6: memref<2x128xf32, #tpu.memory_space<vmem>>) attributes {dimension_semantics = [#tpu.dimension_semantics<parallel>], iteration_bounds = array<i64: 1>, scalar_prefetch = 0 : i64, scratch_operands = 0 : i64, tpu.core_type = #tpu.core_type<tc>, window_params = [{transform_indices = @transform_0, window_bounds = array<i64: 256, 33>}, {pipeline_mode = #tpu.pipeline_mode<synchronous>, transform_indices = @transform_1, window_bounds = array<i64: 33, 256>}, {pipeline_mode = #tpu.pipeline_mode<synchronous>, transform_indices = @transform_2, window_bounds = array<i64: 1, 256>}, {pipeline_mode = #tpu.pipeline_mode<synchronous>, transform_indices = @transform_3, window_bounds = array<i64: 1, 256>}, {transform_indices = @transform_4, window_bounds = array<i64: 1>}, {transform_indices = @transform_5, window_bounds = array<i64: 2, 128>}]} {
    %c0 = arith.constant 0 : index
    %c0_0 = arith.constant 0 : index
    %0 = vector.load %arg1[%c0, %c0_0] : memref<256x33xbf16, #tpu.memory_space<vmem>>, vector<256x33xbf16>
    %c0_1 = arith.constant 0 : index
    %c0_2 = arith.constant 0 : index
    %1 = vector.load %arg2[%c0_1, %c0_2] : memref<33x256xbf16, #tpu.memory_space<vmem>>, vector<33x256xbf16>
    %cst = arith.constant dense<0.000000e+00> : vector<256x256xf32>
    %2 = tpu.matmul %0, %1, %cst {dimension_numbers = #tpu.dot_dimension_numbers<[1], [0], [0], [1], [0, 0, 1, 1], [], []>} : vector<256x33xbf16>, vector<33x256xbf16>, vector<256x256xf32> -> vector<256x256xf32>
    %c0_3 = arith.constant 0 : index
    %c0_4 = arith.constant 0 : index
    %3 = vector.load %arg3[%c0_3, %c0_4] : memref<1x256xf32, #tpu.memory_space<vmem>>, vector<1x256xf32>
    %4 = vector.broadcast %3 : vector<1x256xf32> to vector<256x256xf32>
    %5 = arith.addf %2, %4 : vector<256x256xf32>
    %cst_5 = arith.constant 0.000000e+00 : f32
    %6 = vector.broadcast %cst_5 : f32 to vector<256x256xf32>
    %7 = arith.maximumf %5, %6 : vector<256x256xf32>
    %c0_6 = arith.constant 0 : index
    %c0_7 = arith.constant 0 : index
    %8 = vector.load %arg4[%c0_6, %c0_7] : memref<1x256xf32, #tpu.memory_space<vmem>>, vector<1x256xf32>
    %9 = vector.broadcast %8 : vector<1x256xf32> to vector<256x256xf32>
    %10 = arith.mulf %7, %9 : vector<256x256xf32>
    %11 = vector.shape_cast %10 : vector<256x256xf32> to vector<2x128x256xf32>
    %cst_8 = arith.constant dense<0.000000e+00> : vector<2x128xf32>
    %12 = vector.multi_reduction <add>, %11, %cst_8 [2] : vector<2x128x256xf32> to vector<2x128xf32>
    %c0_9 = arith.constant 0 : index
    %13 = memref.load %arg5[%c0_9] : memref<1xf32, #tpu.memory_space<smem>>
    %14 = vector.broadcast %13 : f32 to vector<2x128xf32>
    %15 = arith.addf %12, %14 : vector<2x128xf32>
    %c0_10 = arith.constant 0 : index
    %c0_11 = arith.constant 0 : index
    %16 = vector.load %arg6[%c0_10, %c0_11] : memref<2x128xf32, #tpu.memory_space<vmem>>, vector<2x128xf32>
    tpu.vector_store %arg6[%c0_10, %c0_11], %15 {strides = array<i32>} : memref<2x128xf32, #tpu.memory_space<vmem>>, vector<2x128xf32>,
    return
  }
  func.func @transform_0(%arg0: i32) -> (i32, i32) {
    %c0_i32 = arith.constant 0 : i32
    %c0_i32_0 = arith.constant 0 : i32
    return %arg0, %c0_i32 : i32, i32
  }
  func.func @transform_1(%arg0: i32) -> (i32, i32) {
    %c0_i32 = arith.constant 0 : i32
    %c0_i32_0 = arith.constant 0 : i32
    %c0_i32_1 = arith.constant 0 : i32
    return %c0_i32, %c0_i32_0 : i32, i32
  }
  func.func @transform_2(%arg0: i32) -> (i32, i32) {
    %c0_i32 = arith.constant 0 : i32
    %c0_i32_0 = arith.constant 0 : i32
    %c0_i32_1 = arith.constant 0 : i32
    return %c0_i32, %c0_i32_0 : i32, i32
  }
  func.func @transform_3(%arg0: i32) -> (i32, i32) {
    %c0_i32 = arith.constant 0 : i32
    %c0_i32_0 = arith.constant 0 : i32
    %c0_i32_1 = arith.constant 0 : i32
    return %c0_i32, %c0_i32_0 : i32, i32
  }
  func.func @transform_4(%arg0: i32) -> i32 {
    %c0_i32 = arith.constant 0 : i32
    %c0_i32_0 = arith.constant 0 : i32
    return %c0_i32 : i32
  }
  func.func @transform_5(%arg0: i32) -> (i32, i32) {
    %c0_i32 = arith.constant 0 : i32
    %c0_i32_0 = arith.constant 0 : i32
    return %arg0, %c0_i32 : i32, i32
  }
}

</mosaic_0001>

<bundles_post_ra>
// kernel: tpu_custom_call.1
= control target key start
LH: loop header
LB: loop body
LE: loop exit
PB: predicated region body
PF: predicated region fallthrough
CT: control target
= control target key end

     0   :  { %vm220_vm0 = vcmask 1040384   ;;  %v983_v3 = vmov 0   ;;  %s1379_s0 = inlined_call_operand.vmem [shape: bf16[256,33], index: 0, kind: input, shape index: {}]   ;;  %s1380_s1 = inlined_call_operand.vmem [shape: bf16[33,256], index: 1, kind: input, shape index: {}]   ;;  %s1381_s2 = inlined_call_operand.vmem [shape: f32[1,256], index: 2, kind: input, shape index: {}]   ;;  %s1382_s3 = inlined_call_operand.vmem [shape: f32[1,256], index: 3, kind: input, shape index: {}]   ;;  %s1383_s4 = inlined_call_operand.<no memory space> [shape: f32[1], index: 4, kind: input, shape index: {}]   ;;  %s1384_s5 = inlined_call_operand.hbm [shape: f32[2,128], index: 5, kind: output, shape index: {}]  }
   0x1   :  { %v59_v0 = vld [vmem:[%s1380_s1 + $0x20] sm:$0x11]  ;;  %v222_v4 = vsel %vm220_vm0, 65535, %v983_v3  ;;  %v891_v7 = vld [vmem:[%s1380_s1 + $0x10] sm:$0xf] }
   0x2   :  { %v159_v1 = vunpack.c.l.b16 %v59_v0  ;;  %v160_v2 = vunpack.c.h.b16 %v59_v0  ;;  %v948_v8 = vld [vmem:[%s1380_s1 + $0x14] sm:$0xf0]  ;;  %v947_v11 = vld [vmem:[%s1380_s1 + $0x14] sm:$0xf]  ;;  %v893_v12 = vld [vmem:[%s1380_s1 + $0x18] sm:$0xf0] }
   0x4   :  { %v165_v5 = vpack.c.b16 %v159_v1, %v159_v1  ;;  %v166_v6 = vpack.c.b16 %v160_v2, %v160_v2 }
   0x6   :  { %v224_v9 = vand.u32 %v222_v4, %v165_v5  ;;  %v227_v10 = vand.u32 %v222_v4, %v166_v6 }
   0x7   :  { %11 = vsyncpa [#allocation4], 0  ;;  %v892_v13 = vor.u32 %v948_v8, %v891_v7  ;;  %v896_v14 = vor.u32 %v947_v11, %v893_v12  ;;  %v883_v15 = vld [vmem:[%s1380_s1] sm:$0xf]  ;;  %v946_v16 = vld [vmem:[%s1380_s1 + $0x4] sm:$0xf0] }
   0x8   :  { %234 = vmatpush.bf16.msra.mxu0 %v224_v9  ;;  %949 = vmatpush.bf16.msra.mxu2 %v224_v9  ;;  %v945_v17 = vld [vmem:[%s1380_s1 + $0x4] sm:$0xf]  ;;  %v885_v18 = vld [vmem:[%s1380_s1 + $0x8] sm:$0xf0]  ;;  %v884_v19 = vor.u32 %v946_v16, %v883_v15  ;;  %vm171_vm1 = vcmask 269312   ;;  %v931_v25 = vld [vmem:[%s1379_s0 + $0x10] sm:$0xff] }
   0x9   :  { %323 = vmatpush.bf16.msra.mxu1 %v227_v10  ;;  %952 = vmatpush.bf16.msra.mxu3 %v227_v10  ;;  %v888_v20 = vor.u32 %v945_v17, %v885_v18  ;;  %v929_v21 = vld [vmem:[%s1379_s0] sm:$0xff]  ;;  %v930_v23 = vld [vmem:[%s1379_s0 + $0x8] sm:$0xff]  ;;  %v939_v26 = vld [vmem:[%s1379_s0 + $0x50] sm:$0xff]  ;;  %vm708_vm2 = vcmask 130112   ;;  %vm712_vm3 = vcmask 195712   ;;  %vm716_vm4 = vcmask 261312  }
   0xa   :  { %v937_v22 = vld [vmem:[%s1379_s0 + $0x40] sm:$0xff]  ;;  %v938_v24 = vld [vmem:[%s1379_s0 + $0x48] sm:$0xff]  ;;  %v932_v27 = vld [vmem:[%s1379_s0 + $0x18] sm:$0xff]  ;;  %vm720_vm5 = vcmask 326912   ;;  %vm724_vm6 = vcmask 392512   ;;  %vm728_vm7 = vcmask 458112  }
   0xb   :  { %v940_v28 = vld [vmem:[%s1379_s0 + $0x58] sm:$0xff]  ;;  %v933_v29 = vld [vmem:[%s1379_s0 + $0x20] sm:$0xff]  ;;  %v934_v31 = vld [vmem:[%s1379_s0 + $0x28] sm:$0xff]  ;;  %vm732_vm8 = vcmask 523712   ;;  %vm736_vm9 = vcmask 589312   ;;  %vm740_vm10 = vcmask 654912  }
   0xc   :  { %235 = vmatpush.bf16.msra.mxu0 %v892_v13  ;;  %950 = vmatpush.bf16.msra.mxu2 %v892_v13  ;;  %v941_v30 = vld [vmem:[%s1379_s0 + $0x60] sm:$0xff]  ;;  %v942_v32 = vld [vmem:[%s1379_s0 + $0x68] sm:$0xff]  ;;  %v935_v33 = vld [vmem:[%s1379_s0 + $0x30] sm:$0xff]  ;;  %vm744_vm11 = vcmask 720512   ;;  %vm748_vm12 = vcmask 786112   ;;  %vm752_vm13 = vcmask 851712  }
   0xd   :  { %324 = vmatpush.bf16.msra.mxu1 %v896_v14  ;;  %953 = vmatpush.bf16.msra.mxu3 %v896_v14  ;;  %v943_v34 = vld [vmem:[%s1379_s0 + $0x70] sm:$0xff]  ;;  %v936_v35 = vld [vmem:[%s1379_s0 + $0x38] sm:$0xff]  ;;  %v60_v37 = vld [vmem:[%s1381_s2] sm:$0x3]  ;;  %vm756_vm14 = vcmask 917312   ;;  %vm760_vm15 = vcmask 982912  }
   0xe   :  { %v944_v36 = vld [vmem:[%s1379_s0 + $0x78] sm:$0xff]  ;;  %v1125_v38 = vperm.slane %v60_v37, 0  ;;  %v1127_v39 = vperm.slane %v60_v37, 1  ;;  %v471_v40 = vld [vmem:[%s1382_s3] sm:$0x3]  ;;  %vm764_vm0 = vcmask 1048512  }
   0xf   :  { %v1133_v44 = vperm.slane %v471_v40, 0  ;;  %v1136_v46 = vperm.slane %v471_v40, 1  ;;  %s984_s3 = smov [#allocation3]   ;;  %s808_s22 = sshll.u32 %s1384_s5, 4  ;;  %s809_s22 = int_to_ptr.hbm [resolvable:$true] %s808_s22 }
  0x10   :  { %236 = vmatpush.bf16.msra.mxu0 %v884_v19  ;;  %951 = vmatpush.bf16.msra.mxu2 %v884_v19 }
  0x11   :  { %325 = vmatpush.bf16.msra.mxu1 %v888_v20  ;;  %954 = vmatpush.bf16.msra.mxu3 %v888_v20 }
  0x13   :  { %897 = vmatmul.msk.bf16.vlgmr.msra.gmra.mxu0 %vm171_vm1, %v929_v21  ;;  %905 = vmatmul.msk.bf16.vlgmr.msra.gmra.mxu2 %vm171_vm1, %v937_v22 }
  0x14   :  { %913 = vmatmul.msk.bf16.vlgmr.msra.gmra.mxu1 %vm171_vm1, %v929_v21  ;;  %921 = vmatmul.msk.bf16.vlgmr.msra.gmra.mxu3 %vm171_vm1, %v937_v22 }
  0x23   :  { %898 = vmatmul.msk.bf16.gmra.mxu0 %vm171_vm1, %v930_v23  ;;  %906 = vmatmul.msk.bf16.gmra.mxu2 %vm171_vm1, %v938_v24 }
  0x24   :  { %914 = vmatmul.msk.bf16.gmra.mxu1 %vm171_vm1, %v930_v23  ;;  %922 = vmatmul.msk.bf16.gmra.mxu3 %vm171_vm1, %v938_v24 }
  0x33   :  { %899 = vmatmul.msk.bf16.gmra.mxu0 %vm171_vm1, %v931_v25  ;;  %907 = vmatmul.msk.bf16.gmra.mxu2 %vm171_vm1, %v939_v26 }
  0x34   :  { %915 = vmatmul.msk.bf16.gmra.mxu1 %vm171_vm1, %v931_v25  ;;  %923 = vmatmul.msk.bf16.gmra.mxu3 %vm171_vm1, %v939_v26 }
  0x43   :  { %900 = vmatmul.msk.bf16.gmra.mxu0 %vm171_vm1, %v932_v27  ;;  %908 = vmatmul.msk.bf16.gmra.mxu2 %vm171_vm1, %v940_v28 }
  0x44   :  { %916 = vmatmul.msk.bf16.gmra.mxu1 %vm171_vm1, %v932_v27  ;;  %924 = vmatmul.msk.bf16.gmra.mxu3 %vm171_vm1, %v940_v28 }
  0x53   :  { %901 = vmatmul.msk.bf16.gmra.mxu0 %vm171_vm1, %v933_v29  ;;  %909 = vmatmul.msk.bf16.gmra.mxu2 %vm171_vm1, %v941_v30 }
  0x54   :  { %917 = vmatmul.msk.bf16.gmra.mxu1 %vm171_vm1, %v933_v29  ;;  %925 = vmatmul.msk.bf16.gmra.mxu3 %vm171_vm1, %v941_v30 }
  0x63   :  { %902 = vmatmul.msk.bf16.gmra.mxu0 %vm171_vm1, %v934_v31  ;;  %910 = vmatmul.msk.bf16.gmra.mxu2 %vm171_vm1, %v942_v32 }
  0x64   :  { %918 = vmatmul.msk.bf16.gmra.mxu1 %vm171_vm1, %v934_v31  ;;  %926 = vmatmul.msk.bf16.gmra.mxu3 %vm171_vm1, %v942_v32 }
  0x73   :  { %903 = vmatmul.msk.bf16.gmra.mxu0 %vm171_vm1, %v935_v33  ;;  %911 = vmatmul.msk.bf16.gmra.mxu2 %vm171_vm1, %v943_v34 }
  0x74   :  { %919 = vmatmul.msk.bf16.gmra.mxu1 %vm171_vm1, %v935_v33  ;;  %927 = vmatmul.msk.bf16.gmra.mxu3 %vm171_vm1, %v943_v34 }
  0x83   :  { %904 = vmatmul.msk.bf16.gmra.mxu0 %vm171_vm1, %v936_v35  ;;  %912 = vmatmul.msk.bf16.gmra.mxu2 %vm171_vm1, %v944_v36 }
  0x84   :  { %920 = vmatmul.msk.bf16.gmra.mxu1 %vm171_vm1, %v936_v35  ;;  %928 = vmatmul.msk.bf16.gmra.mxu3 %vm171_vm1, %v944_v36  ;;  %vm797_vm1 = vcmask 1041409  }
  0x90   :  { %v238_v41 = vpop.f32.mrf.mxu0 }
  0x91   :  { %v239_v42 = vadd.f32 %v238_v41, %v1125_v38  ;;  %v327_v43 = vpop.f32.mrf.mxu1 }
  0x92   :  { %v328_v45 = vadd.f32 %v327_v43, %v1127_v39 }
  0x93   :  { %v407_v47 = vmax.f32 %v239_v42, 0.0 }
  0x94   :  { %v408_v48 = vmax.f32 %v328_v45, 0.0 }
  0x95   :  { %v477_v49 = vmul.f32 %v1133_v44, %v407_v47 }
  0x96   :  { %v278_v50 = vpop.f32.mrf.mxu2  ;;  %v478_v51 = vmul.f32 %v1136_v46, %v408_v48 }
  0x97   :  { %v279_v52 = vadd.f32 %v278_v50, %v1125_v38  ;;  %v367_v53 = vpop.f32.mrf.mxu3 }
  0x98   :  { %v368_v54 = vadd.f32 %v367_v53, %v1127_v39  ;;  %v240_v55 = vpop.f32.mrf.mxu0  ;;  %v541_v56 = vadd.f32 %v478_v51, %v477_v49 }
  0x99   :  { %v439_v57 = vmax.f32 %v279_v52, 0.0  ;;  %v329_v58 = vpop.f32.mrf.mxu1  ;;  %v241_v60 = vadd.f32 %v240_v55, %v1125_v38 }
  0x9a   :  { %v440_v59 = vmax.f32 %v368_v54, 0.0  ;;  %542 = vadd.xlane.f32.xlu0 %v541_v56  ;;  %v330_v63 = vadd.f32 %v329_v58, %v1127_v39 }
  0x9b   :  { %v509_v61 = vmul.f32 %v1133_v44, %v439_v57  ;;  %v409_v1 = vmax.f32 %v241_v60, 0.0 }
  0x9c   :  { %v510_v62 = vmul.f32 %v1136_v46, %v440_v59  ;;  %v410_v4 = vmax.f32 %v330_v63, 0.0 }
  0x9d   :  { %v479_v13 = vmul.f32 %v1133_v44, %v409_v1 }
  0x9e   :  { %v280_v0 = vpop.f32.mrf.mxu2  ;;  %v589_v7 = vadd.f32 %v510_v62, %v509_v61  ;;  %v480_v15 = vmul.f32 %v1136_v46, %v410_v4 }
  0x9f   :  { %v281_v2 = vadd.f32 %v280_v0, %v1125_v38  ;;  %v369_v3 = vpop.f32.mrf.mxu3 }
  0xa0   :  { %v370_v5 = vadd.f32 %v369_v3, %v1127_v39  ;;  %v243_v6 = vpop.f32.mrf.mxu0  ;;  %v544_v27 = vadd.f32 %v480_v15, %v479_v13 }
  0xa1   :  { %v441_v8 = vmax.f32 %v281_v2, 0.0  ;;  %v244_v9 = vadd.f32 %v243_v6, %v1125_v38  ;;  %v332_v10 = vpop.f32.mrf.mxu1 }
  0xa2   :  { %v442_v11 = vmax.f32 %v370_v5, 0.0  ;;  %v333_v12 = vadd.f32 %v332_v10, %v1127_v39  ;;  %590 = vadd.xlane.f32.xlu0 %v589_v7 }
  0xa3   :  { %v511_v14 = vmul.f32 %v1133_v44, %v441_v8  ;;  %v411_v16 = vmax.f32 %v244_v9, 0.0 }
  0xa4   :  { %v412_v17 = vmax.f32 %v333_v12, 0.0  ;;  %v512_v18 = vmul.f32 %v1136_v46, %v442_v11 }
  0xa5   :  { %v481_v23 = vmul.f32 %v1133_v44, %v411_v16 }
  0xa6   :  { %v283_v19 = vpop.f32.mrf.mxu2  ;;  %v592_v20 = vadd.f32 %v512_v18, %v511_v14  ;;  %v482_v24 = vmul.f32 %v1136_v46, %v412_v17 }
  0xa7   :  { %v284_v21 = vadd.f32 %v283_v19, %v1125_v38  ;;  %v372_v22 = vpop.f32.mrf.mxu3 }
  0xa8   :  { %v373_v25 = vadd.f32 %v372_v22, %v1127_v39  ;;  %593 = vadd.xlane.f32.xlu1 %v592_v20  ;;  %v245_v26 = vpop.f32.mrf.mxu0  ;;  %v547_v35 = vadd.f32 %v482_v24, %v481_v23 }
  0xa9   :  { %v443_v28 = vmax.f32 %v284_v21, 0.0  ;;  %v334_v29 = vpop.f32.mrf.mxu1  ;;  %v246_v31 = vadd.f32 %v245_v26, %v1125_v38 }
  0xaa   :  { %v444_v30 = vmax.f32 %v373_v25, 0.0  ;;  %v335_v32 = vadd.f32 %v334_v29, %v1127_v39  ;;  %545 = vadd.xlane.f32.xlu0 %v544_v27 }
  0xab   :  { %v513_v33 = vmul.f32 %v1133_v44, %v443_v28  ;;  %v413_v36 = vmax.f32 %v246_v31, 0.0 }
  0xac   :  { %v514_v34 = vmul.f32 %v1136_v46, %v444_v30  ;;  %v414_v37 = vmax.f32 %v335_v32, 0.0 }
  0xad   :  { %v483_v51 = vmul.f32 %v1133_v44, %v413_v36 }
  0xae   :  { %v285_v40 = vpop.f32.mrf.mxu2  ;;  %v595_v41 = vadd.f32 %v514_v34, %v513_v33  ;;  %v484_v52 = vmul.f32 %v1136_v46, %v414_v37 }
  0xaf   :  { %v286_v42 = vadd.f32 %v285_v40, %v1125_v38  ;;  %v374_v43 = vpop.f32.mrf.mxu3 }
  0xb0   :  { %v375_v45 = vadd.f32 %v374_v43, %v1127_v39  ;;  %596 = vadd.xlane.f32.xlu2 %v595_v41  ;;  %548 = vadd.xlane.f32.xlu1 %v547_v35  ;;  %v248_v47 = vpop.f32.mrf.mxu0  ;;  %v550_v62 = vadd.f32 %v484_v52, %v483_v51 }
  0xb1   :  { %v445_v48 = vmax.f32 %v286_v42, 0.0  ;;  %v249_v49 = vadd.f32 %v248_v47, %v1125_v38  ;;  %v337_v50 = vpop.f32.mrf.mxu1 }
  0xb2   :  { %v446_v53 = vmax.f32 %v375_v45, 0.0  ;;  %v338_v54 = vadd.f32 %v337_v50, %v1127_v39 }
  0xb3   :  { %v515_v55 = vmul.f32 %v1133_v44, %v445_v48  ;;  %v415_v56 = vmax.f32 %v249_v49, 0.0 }
  0xb4   :  { %v516_v57 = vmul.f32 %v1136_v46, %v446_v53  ;;  %v416_v58 = vmax.f32 %v338_v54, 0.0 }
  0xb5   :  { %v485_v59 = vmul.f32 %v1133_v44, %v415_v56 }
  0xb6   :  { %v486_v60 = vmul.f32 %v1136_v46, %v416_v58  ;;  %v288_v61 = vpop.f32.mrf.mxu2  ;;  %v598_v63 = vadd.f32 %v516_v57, %v515_v55 }
  0xb7   :  { %v289_v0 = vadd.f32 %v288_v61, %v1125_v38  ;;  %v377_v1 = vpop.f32.mrf.mxu3 }
  0xb8   :  { %v378_v2 = vadd.f32 %v377_v1, %v1127_v39  ;;  %551 = vadd.xlane.f32.xlu1 %v550_v62  ;;  %599 = vadd.xlane.f32.xlu0 %v598_v63  ;;  %v250_v3 = vpop.f32.mrf.mxu0  ;;  %v553_v4 = vadd.f32 %v486_v60, %v485_v59 }
  0xb9   :  { %v447_v5 = vmax.f32 %v289_v0, 0.0  ;;  %v251_v6 = vadd.f32 %v250_v3, %v1125_v38  ;;  %v339_v7 = vpop.f32.mrf.mxu1 }
  0xba   :  { %v448_v8 = vmax.f32 %v378_v2, 0.0  ;;  %v340_v9 = vadd.f32 %v339_v7, %v1127_v39  ;;  %554 = vadd.xlane.f32.xlu2 %v553_v4 }
  0xbb   :  { %v517_v10 = vmul.f32 %v1133_v44, %v447_v5  ;;  %v417_v11 = vmax.f32 %v251_v6, 0.0 }
  0xbc   :  { %v518_v12 = vmul.f32 %v1136_v46, %v448_v8  ;;  %v418_v13 = vmax.f32 %v340_v9, 0.0 }
  0xbd   :  { %v487_v14 = vmul.f32 %v1133_v44, %v417_v11 }
  0xbe   :  { %v488_v15 = vmul.f32 %v1136_v46, %v418_v13  ;;  %v290_v16 = vpop.f32.mrf.mxu2  ;;  %v601_v17 = vadd.f32 %v518_v12, %v517_v10 }
  0xbf   :  { %v291_v18 = vadd.f32 %v290_v16, %v1125_v38  ;;  %v379_v19 = vpop.f32.mrf.mxu3 }
  0xc0   :  { %v380_v20 = vadd.f32 %v379_v19, %v1127_v39  ;;  %602 = vadd.xlane.f32.xlu1 %v601_v17  ;;  %v253_v21 = vpop.f32.mrf.mxu0  ;;  %v556_v22 = vadd.f32 %v488_v15, %v487_v14 }
  0xc1   :  { %v449_v23 = vmax.f32 %v291_v18, 0.0  ;;  %v254_v24 = vadd.f32 %v253_v21, %v1125_v38  ;;  %v342_v25 = vpop.f32.mrf.mxu1 }
  0xc2   :  { %v450_v26 = vmax.f32 %v380_v20, 0.0  ;;  %v343_v27 = vadd.f32 %v342_v25, %v1127_v39  ;;  %557 = vadd.xlane.f32.xlu2 %v556_v22 }
  0xc3   :  { %v419_v28 = vmax.f32 %v254_v24, 0.0  ;;  %v519_v29 = vmul.f32 %v1133_v44, %v449_v23 }
  0xc4   :  { %v520_v30 = vmul.f32 %v1136_v46, %v450_v26  ;;  %v420_v31 = vmax.f32 %v343_v27, 0.0 }
  0xc5   :  { %v489_v32 = vmul.f32 %v1133_v44, %v419_v28 }
  0xc6   :  { %v490_v33 = vmul.f32 %v1136_v46, %v420_v31  ;;  %v293_v34 = vpop.f32.mrf.mxu2  ;;  %v604_v41 = vadd.f32 %v520_v30, %v519_v29 }
  0xc7   :  { %v294_v35 = vadd.f32 %v293_v34, %v1125_v38  ;;  %v382_v36 = vpop.f32.mrf.mxu3 }
  0xc8   :  { %v383_v37 = vadd.f32 %v382_v36, %v1127_v39  ;;  %v255_v40 = vpop.f32.mrf.mxu0  ;;  %v559_v42 = vadd.f32 %v490_v33, %v489_v32 }
  0xc9   :  { %v451_v43 = vmax.f32 %v294_v35, 0.0  ;;  %v256_v45 = vadd.f32 %v255_v40, %v1125_v38  ;;  %v344_v47 = vpop.f32.mrf.mxu1 }
  0xca   :  { %v452_v48 = vmax.f32 %v383_v37, 0.0  ;;  %v345_v49 = vadd.f32 %v344_v47, %v1127_v39  ;;  %605 = vadd.xlane.f32.xlu2 %v604_v41  ;;  %560 = vadd.xlane.f32.xlu0 %v559_v42 }
  0xcb   :  { %v421_v50 = vmax.f32 %v256_v45, 0.0  ;;  %v521_v51 = vmul.f32 %v1133_v44, %v451_v43 }
  0xcc   :  { %v522_v52 = vmul.f32 %v1136_v46, %v452_v48  ;;  %v422_v53 = vmax.f32 %v345_v49, 0.0 }
  0xcd   :  { %v491_v54 = vmul.f32 %v1133_v44, %v421_v50 }
  0xce   :  { %v492_v55 = vmul.f32 %v1136_v46, %v422_v53  ;;  %v295_v56 = vpop.f32.mrf.mxu2  ;;  %v607_v62 = vadd.f32 %v522_v52, %v521_v51 }
  0xcf   :  { %v296_v57 = vadd.f32 %v295_v56, %v1125_v38  ;;  %v384_v58 = vpop.f32.mrf.mxu3 }
  0xd0   :  { %v385_v59 = vadd.f32 %v384_v58, %v1127_v39  ;;  %v258_v60 = vpop.f32.mrf.mxu0  ;;  %v562_v61 = vadd.f32 %v492_v55, %v491_v54 }
  0xd1   :  { %v453_v63 = vmax.f32 %v296_v57, 0.0  ;;  %v259_v0 = vadd.f32 %v258_v60, %v1125_v38  ;;  %v347_v1 = vpop.f32.mrf.mxu1 }
  0xd2   :  { %v454_v2 = vmax.f32 %v385_v59, 0.0  ;;  %v348_v3 = vadd.f32 %v347_v1, %v1127_v39  ;;  %563 = vadd.xlane.f32.xlu1 %v562_v61  ;;  %608 = vadd.xlane.f32.xlu0 %v607_v62 }
  0xd3   :  { %v423_v4 = vmax.f32 %v259_v0, 0.0  ;;  %v523_v5 = vmul.f32 %v1133_v44, %v453_v63 }
  0xd4   :  { %v524_v6 = vmul.f32 %v1136_v46, %v454_v2  ;;  %v424_v7 = vmax.f32 %v348_v3, 0.0 }
  0xd5   :  { %v493_v8 = vmul.f32 %v1133_v44, %v423_v4 }
  0xd6   :  { %v494_v9 = vmul.f32 %v1136_v46, %v424_v7  ;;  %v298_v10 = vpop.f32.mrf.mxu2  ;;  %v610_v16 = vadd.f32 %v524_v6, %v523_v5 }
  0xd7   :  { %v299_v11 = vadd.f32 %v298_v10, %v1125_v38  ;;  %v387_v12 = vpop.f32.mrf.mxu3 }
  0xd8   :  { %v388_v13 = vadd.f32 %v387_v12, %v1127_v39  ;;  %v260_v14 = vpop.f32.mrf.mxu0  ;;  %v565_v15 = vadd.f32 %v494_v9, %v493_v8 }
  0xd9   :  { %v455_v17 = vmax.f32 %v299_v11, 0.0  ;;  %v261_v18 = vadd.f32 %v260_v14, %v1125_v38  ;;  %v349_v19 = vpop.f32.mrf.mxu1 }
  0xda   :  { %v456_v20 = vmax.f32 %v388_v13, 0.0  ;;  %v350_v21 = vadd.f32 %v349_v19, %v1127_v39  ;;  %566 = vadd.xlane.f32.xlu2 %v565_v15  ;;  %611 = vadd.xlane.f32.xlu1 %v610_v16 }
  0xdb   :  { %v425_v22 = vmax.f32 %v261_v18, 0.0  ;;  %v525_v23 = vmul.f32 %v1133_v44, %v455_v17 }
  0xdc   :  { %v526_v24 = vmul.f32 %v1136_v46, %v456_v20  ;;  %v426_v25 = vmax.f32 %v350_v21, 0.0 }
  0xdd   :  { %v495_v26 = vmul.f32 %v1133_v44, %v425_v22 }
  0xde   :  { %v496_v27 = vmul.f32 %v1136_v46, %v426_v25  ;;  %v300_v28 = vpop.f32.mrf.mxu2  ;;  %v613_v33 = vadd.f32 %v526_v24, %v525_v23 }
  0xdf   :  { %v301_v29 = vadd.f32 %v300_v28, %v1125_v38  ;;  %v389_v30 = vpop.f32.mrf.mxu3 }
  0xe0   :  { %v390_v31 = vadd.f32 %v389_v30, %v1127_v39  ;;  %v263_v32 = vpop.f32.mrf.mxu0  ;;  %v568_v34 = vadd.f32 %v496_v27, %v495_v26 }
  0xe1   :  { %v457_v35 = vmax.f32 %v301_v29, 0.0  ;;  %v264_v36 = vadd.f32 %v263_v32, %v1125_v38  ;;  %v352_v37 = vpop.f32.mrf.mxu1 }
  0xe2   :  { %v458_v40 = vmax.f32 %v390_v31, 0.0  ;;  %v353_v41 = vadd.f32 %v352_v37, %v1127_v39  ;;  %614 = vadd.xlane.f32.xlu2 %v613_v33  ;;  %569 = vadd.xlane.f32.xlu0 %v568_v34 }
  0xe3   :  { %v427_v42 = vmax.f32 %v264_v36, 0.0  ;;  %v527_v43 = vmul.f32 %v1133_v44, %v457_v35 }
  0xe4   :  { %v528_v45 = vmul.f32 %v1136_v46, %v458_v40  ;;  %v428_v47 = vmax.f32 %v353_v41, 0.0 }
  0xe5   :  { %v497_v48 = vmul.f32 %v1133_v44, %v427_v42 }
  0xe6   :  { %v498_v49 = vmul.f32 %v1136_v46, %v428_v47  ;;  %v303_v50 = vpop.f32.mrf.mxu2  ;;  %v616_v56 = vadd.f32 %v528_v45, %v527_v43 }
  0xe7   :  { %v304_v51 = vadd.f32 %v303_v50, %v1125_v38  ;;  %v392_v52 = vpop.f32.mrf.mxu3 }
  0xe8   :  { %v393_v53 = vadd.f32 %v392_v52, %v1127_v39  ;;  %v265_v54 = vpop.f32.mrf.mxu0  ;;  %v571_v55 = vadd.f32 %v498_v49, %v497_v48 }
  0xe9   :  { %v459_v57 = vmax.f32 %v304_v51, 0.0  ;;  %v266_v58 = vadd.f32 %v265_v54, %v1125_v38  ;;  %v354_v59 = vpop.f32.mrf.mxu1 }
  0xea   :  { %v460_v60 = vmax.f32 %v393_v53, 0.0  ;;  %v355_v61 = vadd.f32 %v354_v59, %v1127_v39  ;;  %572 = vadd.xlane.f32.xlu1 %v571_v55  ;;  %617 = vadd.xlane.f32.xlu0 %v616_v56 }
  0xeb   :  { %v429_v62 = vmax.f32 %v266_v58, 0.0  ;;  %v529_v63 = vmul.f32 %v1133_v44, %v459_v57 }
  0xec   :  { %v530_v0 = vmul.f32 %v1136_v46, %v460_v60  ;;  %v430_v1 = vmax.f32 %v355_v61, 0.0 }
  0xed   :  { %v499_v2 = vmul.f32 %v1133_v44, %v429_v62 }
  0xee   :  { %v500_v3 = vmul.f32 %v1136_v46, %v430_v1  ;;  %v305_v4 = vpop.f32.mrf.mxu2  ;;  %v619_v10 = vadd.f32 %v530_v0, %v529_v63 }
  0xef   :  { %v306_v5 = vadd.f32 %v305_v4, %v1125_v38  ;;  %v394_v6 = vpop.f32.mrf.mxu3 }
  0xf0   :  { %v395_v7 = vadd.f32 %v394_v6, %v1127_v39  ;;  %v268_v8 = vpop.f32.mrf.mxu0  ;;  %v574_v9 = vadd.f32 %v500_v3, %v499_v2 }
  0xf1   :  { %v461_v11 = vmax.f32 %v306_v5, 0.0  ;;  %v269_v12 = vadd.f32 %v268_v8, %v1125_v38  ;;  %v357_v13 = vpop.f32.mrf.mxu1 }
  0xf2   :  { %v462_v14 = vmax.f32 %v395_v7, 0.0  ;;  %v358_v15 = vadd.f32 %v357_v13, %v1127_v39  ;;  %575 = vadd.xlane.f32.xlu2 %v574_v9  ;;  %620 = vadd.xlane.f32.xlu1 %v619_v10 }
  0xf3   :  { %v431_v16 = vmax.f32 %v269_v12, 0.0  ;;  %v531_v17 = vmul.f32 %v1133_v44, %v461_v11 }
  0xf4   :  { %v532_v18 = vmul.f32 %v1136_v46, %v462_v14  ;;  %v432_v19 = vmax.f32 %v358_v15, 0.0 }
  0xf5   :  { %v501_v20 = vmul.f32 %v1133_v44, %v431_v16 }
  0xf6   :  { %v502_v21 = vmul.f32 %v1136_v46, %v432_v19  ;;  %v308_v22 = vpop.f32.mrf.mxu2  ;;  %v622_v27 = vadd.f32 %v532_v18, %v531_v17 }
  0xf7   :  { %v309_v23 = vadd.f32 %v308_v22, %v1125_v38  ;;  %v397_v24 = vpop.f32.mrf.mxu3 }
  0xf8   :  { %v398_v25 = vadd.f32 %v397_v24, %v1127_v39  ;;  %v270_v26 = vpop.f32.mrf.mxu0  ;;  %v577_v28 = vadd.f32 %v502_v21, %v501_v20 }
  0xf9   :  { %v463_v29 = vmax.f32 %v309_v23, 0.0  ;;  %v271_v30 = vadd.f32 %v270_v26, %v1125_v38  ;;  %v359_v31 = vpop.f32.mrf.mxu1 }
  0xfa   :  { %v464_v32 = vmax.f32 %v398_v25, 0.0  ;;  %v360_v33 = vadd.f32 %v359_v31, %v1127_v39  ;;  %623 = vadd.xlane.f32.xlu2 %v622_v27  ;;  %578 = vadd.xlane.f32.xlu0 %v577_v28 }
  0xfb   :  { %v533_v34 = vmul.f32 %v1133_v44, %v463_v29  ;;  %v433_v35 = vmax.f32 %v271_v30, 0.0 }
  0xfc   :  { %v534_v36 = vmul.f32 %v1136_v46, %v464_v32  ;;  %v434_v37 = vmax.f32 %v360_v33, 0.0 }
  0xfd   :  { %v503_v40 = vmul.f32 %v1133_v44, %v433_v35 }
  0xfe   :  { %v504_v41 = vmul.f32 %v1136_v46, %v434_v37  ;;  %v310_v42 = vpop.f32.mrf.mxu2  ;;  %v625_v43 = vadd.f32 %v534_v36, %v533_v34 }
  0xff   :  { %v311_v45 = vadd.f32 %v310_v42, %v1125_v38  ;;  %v399_v47 = vpop.f32.mrf.mxu3 }
 0x100   :  { %v400_v48 = vadd.f32 %v399_v47, %v1127_v39  ;;  %626 = vadd.xlane.f32.xlu1 %v625_v43  ;;  %v273_v49 = vpop.f32.mrf.mxu0  ;;  %v580_v50 = vadd.f32 %v504_v41, %v503_v40  ;;  %v703_v47 = vlaneseq }
 0x101   :  { %v465_v51 = vmax.f32 %v311_v45, 0.0  ;;  %v274_v52 = vadd.f32 %v273_v49, %v1125_v38  ;;  %v362_v53 = vpop.f32.mrf.mxu1  ;;  %v1275_v49 = vstv %s1383_s4  ;;  %s806_s4 = sshll.u32 %s984_s3, 4  ;;  %s807_s4 = int_to_ptr.vmem [resolvable:$true] %s806_s4 }
 0x102   :  { %v466_v54 = vmax.f32 %v400_v48, 0.0  ;;  %v363_v55 = vadd.f32 %v362_v53, %v1127_v39  ;;  %581 = vadd.xlane.f32.xlu2 %v580_v50  ;;  %v1277_v50 = vand.u32 127, %v703_v47 }
 0x103   :  { %v535_v56 = vmul.f32 %v1133_v44, %v465_v51  ;;  %v435_v57 = vmax.f32 %v274_v52, 0.0 }
 0x104   :  { %v536_v58 = vmul.f32 %v1136_v46, %v466_v54  ;;  %v436_v59 = vmax.f32 %v363_v55, 0.0  ;;  %v706_v52 = vadd.s32 4294967288, %v1277_v50 }
 0x105   :  { %v505_v60 = vmul.f32 %v1133_v44, %v435_v57  ;;  %v710_v57 = vadd.s32 4294967280, %v1277_v50 }
 0x106   :  { %v506_v61 = vmul.f32 %v1136_v46, %v436_v59  ;;  %v313_v62 = vpop.f32.mrf.mxu2  ;;  %v628_v63 = vadd.f32 %v536_v58, %v535_v56  ;;  %v714_v59 = vadd.s32 4294967272, %v1277_v50 }
 0x107   :  { %v314_v0 = vadd.f32 %v313_v62, %v1125_v38  ;;  %v402_v1 = vpop.f32.mrf.mxu3 }
 0x108   :  { %v403_v2 = vadd.f32 %v402_v1, %v1127_v39  ;;  %629 = vadd.xlane.f32.xlu0 %v628_v63  ;;  %v275_v3 = vpop.f32.mrf.mxu0  ;;  %v583_v4 = vadd.f32 %v506_v61, %v505_v60 }
 0x109   :  { %v467_v5 = vmax.f32 %v314_v0, 0.0  ;;  %v276_v6 = vadd.f32 %v275_v3, %v1125_v38  ;;  %v364_v7 = vpop.f32.mrf.mxu1  ;;  %v718_v3 = vadd.s32 4294967264, %v1277_v50 }
 0x10a   :  { %v468_v8 = vmax.f32 %v403_v2, 0.0  ;;  %v365_v9 = vadd.f32 %v364_v7, %v1127_v39  ;;  %584 = vadd.xlane.f32.xlu1 %v583_v4 }
 0x10b   :  { %v537_v10 = vmul.f32 %v1133_v44, %v467_v5  ;;  %v437_v11 = vmax.f32 %v276_v6, 0.0 }
 0x10c   :  { %v538_v12 = vmul.f32 %v1136_v46, %v468_v8  ;;  %v438_v13 = vmax.f32 %v365_v9, 0.0 }
 0x10d   :  { %v507_v14 = vmul.f32 %v1133_v44, %v437_v11  ;;  %v543_v27 = vpop.xlane.xlu0 %542  ;;  %v722_v11 = vadd.s32 4294967256, %v1277_v50 }
 0x10e   :  { %v508_v15 = vmul.f32 %v1136_v46, %v438_v13  ;;  %v315_v16 = vpop.f32.mrf.mxu2  ;;  %v631_v17 = vadd.f32 %v538_v12, %v537_v10  ;;  %v639_v55 = vadd.f32 %v1275_v49, %v543_v27 }
 0x10f   :  { %v316_v18 = vadd.f32 %v315_v16, %v1125_v38  ;;  %v404_v19 = vpop.f32.mrf.mxu3 }
 0x110   :  { %v405_v20 = vadd.f32 %v404_v19, %v1127_v39  ;;  %632 = vadd.xlane.f32.xlu2 %v631_v17  ;;  %v586_v21 = vadd.f32 %v508_v15, %v507_v14  ;;  %v705_v1 = vperm.slane %v639_v55, %v1277_v50  ;;  %v726_v15 = vadd.s32 4294967248, %v1277_v50 }
 0x111   :  { %v469_v22 = vmax.f32 %v316_v18, 0.0  ;;  %v730_v19 = vadd.s32 4294967240, %v1277_v50 }
 0x112   :  { %v470_v23 = vmax.f32 %v405_v20, 0.0  ;;  %587 = vadd.xlane.f32.xlu0 %v586_v21 }
 0x113   :  { %v539_v24 = vmul.f32 %v1133_v44, %v469_v22 }
 0x114   :  { %v540_v25 = vmul.f32 %v1136_v46, %v470_v23 }
 0x115   :  { %v591_v30 = vpop.xlane.xlu0 %590 }
 0x116   :  { %v634_v26 = vadd.f32 %v540_v25, %v539_v24  ;;  %v655_v56 = vadd.f32 %v1275_v49, %v591_v30 }
 0x118   :  { %635 = vadd.xlane.f32.xlu1 %v634_v26  ;;  %v766_v4 = vperm.slane %v655_v56, %v1277_v50 }
 0x11b   :  { %v594_v28 = vpop.xlane.xlu1 %593 }
 0x11c   :  { %v656_v53 = vadd.f32 %v1275_v49, %v594_v28  ;;  %v1316_v28 = vadd.s32 4294967232, %v1277_v50 }
 0x11d   :  { %v546_v32 = vpop.xlane.xlu0 %545 }
 0x11e   :  { %v640_v54 = vadd.f32 %v1275_v49, %v546_v32  ;;  %v767_v62 = vperm.slane %v656_v53, %v706_v52  ;;  %v742_v53 = vadd.s32 4294967216, %v1277_v50 }
 0x120   :  { %v707_v63 = vperm.slane %v640_v54, %v706_v52  ;;  %v768_v12 = vsel %vm708_vm2, %v767_v62, %v766_v4 }
 0x122   :  { %v709_v13 = vsel %vm708_vm2, %v707_v63, %v705_v1  ;;  %v750_v63 = vadd.s32 4294967200, %v1277_v50 }
 0x123   :  { %v597_v29 = vpop.xlane.xlu2 %596  ;;  %v549_v38 = vpop.xlane.xlu1 %548 }
 0x124   :  { %v641_v58 = vadd.f32 %v1275_v49, %v549_v38  ;;  %v657_v2 = vadd.f32 %v1275_v49, %v597_v29 }
 0x126   :  { %v711_v5 = vperm.slane %v641_v58, %v710_v57  ;;  %v769_v16 = vperm.slane %v657_v2, %v710_v57 }
 0x128   :  { %v713_v20 = vsel %vm712_vm3, %v711_v5, %v709_v13  ;;  %v770_v38 = vsel %vm712_vm3, %v769_v16, %v768_v12 }
 0x12b   :  { %v552_v39 = vpop.xlane.xlu1 %551  ;;  %v600_v34 = vpop.xlane.xlu0 %599 }
 0x12c   :  { %v642_v60 = vadd.f32 %v1275_v49, %v552_v39  ;;  %v658_v6 = vadd.f32 %v1275_v49, %v600_v34 }
 0x12d   :  { %v555_v31 = vpop.xlane.xlu2 %554 }
 0x12e   :  { %v643_v7 = vadd.f32 %v1275_v49, %v555_v31  ;;  %v715_v9 = vperm.slane %v642_v60, %v714_v59  ;;  %v771_v21 = vperm.slane %v658_v6, %v714_v59  ;;  %v746_v59 = vadd.s32 4294967208, %v1277_v50 }
 0x12f   :  { %v754_v6 = vadd.s32 4294967192, %v1277_v50 }
 0x130   :  { %v719_v22 = vperm.slane %v643_v7, %v718_v3  ;;  %v717_v24 = vsel %vm716_vm4, %v715_v9, %v713_v20  ;;  %v772_v34 = vsel %vm716_vm4, %v771_v21, %v770_v38 }
 0x133   :  { %v603_v36 = vpop.xlane.xlu1 %602 }
 0x134   :  { %v659_v10 = vadd.f32 %v1275_v49, %v603_v36 }
 0x135   :  { %v558_v33 = vpop.xlane.xlu2 %557 }
 0x136   :  { %v644_v14 = vadd.f32 %v1275_v49, %v558_v33  ;;  %v773_v25 = vperm.slane %v659_v10, %v718_v3 }
 0x138   :  { %v723_v27 = vperm.slane %v644_v14, %v722_v11 }
 0x13d   :  { %v606_v35 = vpop.xlane.xlu2 %605  ;;  %v561_v37 = vpop.xlane.xlu0 %560 }
 0x13e   :  { %v660_v17 = vadd.f32 %v1275_v49, %v606_v35  ;;  %v645_v18 = vadd.f32 %v1275_v49, %v561_v37  ;;  %v721_v35 = vsel %vm720_vm5, %v719_v22, %v717_v24 }
 0x140   :  { %v775_v32 = vperm.slane %v660_v17, %v722_v11  ;;  %v727_v33 = vperm.slane %v645_v18, %v726_v15 }
 0x145   :  { %v564_v41 = vpop.xlane.xlu1 %563  ;;  %v609_v44 = vpop.xlane.xlu0 %608 }
 0x146   :  { %v646_v23 = vadd.f32 %v1275_v49, %v564_v41  ;;  %v661_v26 = vadd.f32 %v1275_v49, %v609_v44  ;;  %v774_v41 = vsel %vm720_vm5, %v773_v25, %v772_v34 }
 0x147   :  { %v776_v54 = vsel %vm724_vm6, %v775_v32, %v774_v41 }
 0x148   :  { %v731_v36 = vperm.slane %v646_v23, %v730_v19  ;;  %v777_v44 = vperm.slane %v661_v26, %v726_v15 }
 0x14a   :  { %v778_v60 = vsel %vm728_vm7, %v777_v44, %v776_v54 }
 0x14d   :  { %v567_v40 = vpop.xlane.xlu2 %566  ;;  %v612_v46 = vpop.xlane.xlu1 %611 }
 0x14e   :  { %v647_v29 = vadd.f32 %v1275_v49, %v567_v40  ;;  %v662_v30 = vadd.f32 %v1275_v49, %v612_v46  ;;  %v738_v40 = vadd.s32 4294967224, %v1277_v50  ;;  %v725_v46 = vsel %vm724_vm6, %v723_v27, %v721_v35 }
 0x14f   :  { %v729_v55 = vsel %vm728_vm7, %v727_v33, %v725_v46 }
 0x150   :  { %v735_v47 = vperm.slane %v647_v29, %v1316_v28  ;;  %v779_v52 = vperm.slane %v662_v30, %v730_v19  ;;  %v733_v57 = vsel %vm732_vm8, %v731_v36, %v729_v55 }
 0x152   :  { %v737_v1 = vsel %vm736_vm9, %v735_v47, %v733_v57 }
 0x155   :  { %v1264_v42 = vpop.xlane.xlu2 %614  ;;  %v1266_v43 = vpop.xlane.xlu0 %569 }
 0x156   :  { %v663_v56 = vadd.f32 %v1275_v49, %v1264_v42  ;;  %v648_v58 = vadd.f32 %v1275_v49, %v1266_v43  ;;  %v780_v42 = vsel %vm732_vm8, %v779_v52, %v778_v60 }
 0x158   :  { %v781_v4 = vperm.slane %v663_v56, %v1316_v28  ;;  %v739_v9 = vperm.slane %v648_v58, %v738_v40 }
 0x15a   :  { %v782_v20 = vsel %vm736_vm9, %v781_v4, %v780_v42  ;;  %v741_v21 = vsel %vm740_vm10, %v739_v9, %v737_v1 }
 0x15d   :  { %v1270_v48 = vpop.xlane.xlu1 %572  ;;  %v1279_v51 = vpop.xlane.xlu0 %617 }
 0x15e   :  { %v664_v62 = vadd.f32 %v1275_v49, %v1279_v51  ;;  %v649_v2 = vadd.f32 %v1275_v49, %v1270_v48 }
 0x160   :  { %v783_v11 = vperm.slane %v664_v62, %v738_v40  ;;  %v743_v14 = vperm.slane %v649_v2, %v742_v53 }
 0x162   :  { %v784_v24 = vsel %vm740_vm10, %v783_v11, %v782_v20  ;;  %v745_v27 = vsel %vm744_vm11, %v743_v14, %v741_v21 }
 0x165   :  { %v1268_v45 = vpop.xlane.xlu2 %575  ;;  %v1292_v0 = vpop.xlane.xlu1 %620 }
 0x166   :  { %v665_v43 = vadd.f32 %v1275_v49, %v1292_v0  ;;  %v650_v5 = vadd.f32 %v1275_v49, %v1268_v45  ;;  %v758_v45 = vadd.s32 4294967184, %v1277_v50 }
 0x168   :  { %v747_v17 = vperm.slane %v650_v5, %v746_v59 }
 0x16d   :  { %v1290_v61 = vpop.xlane.xlu2 %623  ;;  %v1300_v8 = vpop.xlane.xlu0 %578 }
 0x16e   :  { %v666_v51 = vadd.f32 %v1275_v49, %v1290_v61  ;;  %v651_v10 = vadd.f32 %v1275_v49, %v1300_v8  ;;  %v785_v61 = vperm.slane %v665_v43, %v742_v53  ;;  %v762_v8 = vadd.s32 4294967176, %v1277_v50 }
 0x170   :  { %v787_v18 = vperm.slane %v666_v51, %v746_v59  ;;  %v751_v22 = vperm.slane %v651_v10, %v750_v63  ;;  %v786_v28 = vsel %vm744_vm11, %v785_v61, %v784_v24 }
 0x172   :  { %v788_v38 = vsel %vm748_vm12, %v787_v18, %v786_v28 }
 0x173   :  { %v627_v31 = vpop.xlane.xlu1 %626 }
 0x174   :  { %v667_v48 = vadd.f32 %v1275_v49, %v627_v31  ;;  %v749_v31 = vsel %vm748_vm12, %v747_v17, %v745_v27 }
 0x175   :  { %v582_v39 = vpop.xlane.xlu2 %581 }
 0x176   :  { %v652_v12 = vadd.f32 %v1275_v49, %v582_v39  ;;  %v789_v23 = vperm.slane %v667_v48, %v750_v63  ;;  %v753_v39 = vsel %vm752_vm13, %v751_v22, %v749_v31 }
 0x178   :  { %v755_v25 = vperm.slane %v652_v12, %v754_v6  ;;  %v790_v34 = vsel %vm752_vm13, %v789_v23, %v788_v38 }
 0x17a   :  { %v757_v35 = vsel %vm756_vm14, %v755_v25, %v753_v39 }
 0x17b   :  { %v630_v37 = vpop.xlane.xlu0 %629 }
 0x17c   :  { %v668_v13 = vadd.f32 %v1275_v49, %v630_v37 }
 0x17d   :  { %v585_v3 = vpop.xlane.xlu1 %584 }
 0x17e   :  { %v653_v15 = vadd.f32 %v1275_v49, %v585_v3  ;;  %v791_v26 = vperm.slane %v668_v13, %v754_v6 }
 0x180   :  { %v759_v29 = vperm.slane %v653_v15, %v758_v45  ;;  %v792_v36 = vsel %vm756_vm14, %v791_v26, %v790_v34 }
 0x182   :  { %v761_v41 = vsel %vm760_vm15, %v759_v29, %v757_v35 }
 0x183   :  { %v633_v7 = vpop.xlane.xlu2 %632 }
 0x184   :  { %v669_v16 = vadd.f32 %v1275_v49, %v633_v7 }
 0x185   :  { %v588_v0 = vpop.xlane.xlu0 %587 }
 0x186   :  { %v654_v19 = vadd.f32 %v1275_v49, %v588_v0  ;;  %v793_v30 = vperm.slane %v669_v16, %v758_v45 }
 0x188   :  { %v763_v32 = vperm.slane %v654_v19, %v762_v8 }
 0x18a   :  { %v765_v44 = vsel %vm764_vm0, %v763_v32, %v761_v41 }
 0x18b   :  { %v636_v50 = vpop.xlane.xlu1 %635 }
 0x18c   :  { %v670_v33 = vadd.f32 %v1275_v49, %v636_v50  ;;  %v794_v49 = vsel %vm760_vm15, %v793_v30, %v792_v36 }
 0x18e   :  { %v795_v37 = vperm.slane %v670_v33, %v762_v8 }
 0x190   :  { %v796_v40 = vsel %vm764_vm0, %v795_v37, %v794_v49 }
 0x191   :  { %v798_v46 = vsel %vm797_vm1, %v796_v40, %v765_v44 }
 0x192   :  { %800 = vst [vmem:[#allocation3] sm:$0x3] %v798_v46 }
 0x193   :  { %811 = dma.vmem_to_hbm [thread:$0]  %s807_s4, 32, %s809_s22, [#allocation4]  }
 0x194   :  { %981 = dma.done.wait [#allocation4], 32  }
 0x195   :  { %982 = vsyncadd [#allocation4], 4294967264 }
 0x196   :  { %816 = vsyncpa [#allocation4], 1 }

</bundles_post_ra>
